<compile_context>
chip_gen: v5e
topology: v5e:2x2
jax: 0.10.0
libtpu: 0.0.40
codegen_flags: <defaults>
</compile_context>

<pallas_src>
import functools

import jax
import jax.numpy as jnp
from jax.experimental import pallas as pl
from jax.experimental.pallas import tpu as pltpu


def _round_up(n, m):
    return ((n + m - 1) // m) * m


def _vmem_capacity_bytes():
    try:
        return int(pltpu.get_tpu_info().vmem_capacity_bytes)
    except Exception:  # interpret mode / older jax: assume the smallest chip (v7x)
        return 64 * 2**20


def _default_batch_tile(in_f, x_itemsize):
    """Largest x tile that keeps the triple-buffered x stream well inside VMEM."""
    vmem_cap = _vmem_capacity_bytes()
    # ~1/3 of physical VMEM (capped) for the x buffers; the rest is left for the
    # resident W1, the (tb, 128) f32 h intermediate, the output block & scratch.
    x_budget = min(vmem_cap // 3, 28 * 2**20)
    tb = x_budget // (3 * in_f * x_itemsize)
    tb = max(256, min(tb, 8192))
    return (tb // 8) * 8


def _vmem_limit_bytes(tb, in_f, hidden, x_itemsize, w_itemsize, n_x_buf):
    est = n_x_buf * tb * in_f * x_itemsize      # streamed x tiles
    est += 2 * in_f * hidden * w_itemsize       # resident W1 (double-buffered)
    est += 2 * 2 * hidden * 4                   # b1 + W2 row
    est += 2 * tb * 128 * 4                     # (tb, 1) output block, lane-padded
    est += 3 * tb * hidden * 4                  # f32 h intermediate, casts, staging
    est = (est * 3) // 2                        # headroom for internal scratch
    cap = _vmem_capacity_bytes()
    return int(min(max(est, 16 * 2**20), cap))


def discriminator_kernel(x_ref, w1_ref, b1_ref, w2_ref, b2_ref, o_ref, *, mxu_dtype):
    """Fused MLP forward for one batch tile.

    x_ref : (tb, in_f)    VMEM  (native x dtype, streamed)
    w1_ref: (in_f, 128)   VMEM  (resident across grid steps)
    b1_ref: (1, 128)      VMEM  f32
    w2_ref: (1, 128)      VMEM  f32  (second-layer weight as a row)
    b2_ref: (1,)          SMEM  f32  scalar
    o_ref : (tb, 1)       VMEM  f32
    """
    x = x_ref[...]
    w1 = w1_ref[...]
    # Optional in-kernel cast (VPU) for the MXU operands — no extra HBM traffic.
    if x.dtype != mxu_dtype:
        x = x.astype(mxu_dtype)
    if w1.dtype != mxu_dtype:
        w1 = w1.astype(mxu_dtype)

    # Layer 1 on the MXU with f32 accumulation; bias + LeakyReLU on the VPU.
    h = jnp.dot(x, w1, preferred_element_type=jnp.float32)
    h = h + b1_ref[...]
    h = jnp.where(h >= 0, h, 0.01 * h)  # LeakyReLU(0.01)

    # Layer 2 (128 -> 1): a (tb,128)x(128,1) matmul would use 1/256 MXU columns;
    # do it as a VPU broadcast-multiply + XLU lane reduction instead.
    y = jnp.sum(h * w2_ref[...], axis=-1, keepdims=True) + b2_ref[0]  # (tb, 1)

    # Numerically stable sigmoid: exp(-|y|) never overflows (EUP).
    z = jnp.exp(-jnp.abs(y))
    sig = jnp.where(y >= 0, 1.0 / (1.0 + z), z / (1.0 + z))
    o_ref[...] = sig.astype(o_ref.dtype)


def discriminator_forward(x, w1, b1, w2, b2, *, batch_tile=None, compute_dtype=None):
    """Forward pass.

    x : (B, in_f)   — streamed in its native dtype (pass bf16 for a half-BW stream)
    w1: (in_f, 128), b1: (128,) or (1,128), w2: (128,1), b2: (1,) or (1,1)
    compute_dtype: optional MXU operand dtype (cast happens inside the kernel).
    Returns (B, 1) float32.
    """
    B, in_f = x.shape
    hidden = w1.shape[1]
    assert w1.shape == (in_f, hidden)
    assert w2.reshape(-1).shape == (hidden,)

    x_itemsize = jnp.dtype(x.dtype).itemsize
    if batch_tile is None:
        batch_tile = _default_batch_tile(in_f, x_itemsize)
    # Clamp to the (8-aligned) batch; ragged last tile is handled by Pallas.
    tb = max(8, min(int(batch_tile), _round_up(B, 8)))
    tb = (tb // 8) * 8
    num_tiles = pl.cdiv(B, tb)

    mxu_dtype = jnp.dtype(compute_dtype) if compute_dtype is not None else jnp.dtype(x.dtype)

    b1_in = b1.reshape(1, hidden).astype(jnp.float32)
    w2_row = w2.reshape(1, hidden).astype(jnp.float32)
    b2_s = b2.reshape(1).astype(jnp.float32)

    # Deeper buffering on the streamed x tile only; the constant-index specs
    # (W1, b1, W2) stay at the default and are tiny next to the x stream.
    use_buffered = num_tiles >= 3
    if use_buffered:
        x_spec = pl.BlockSpec((tb, in_f), lambda i: (i, 0), pipeline_mode=pl.Buffered(3))
        n_x_buf = 3
    else:
        x_spec = pl.BlockSpec((tb, in_f), lambda i: (i, 0))
        n_x_buf = 2

    vmem_limit = _vmem_limit_bytes(tb, in_f, hidden, x_itemsize,
                                   jnp.dtype(w1.dtype).itemsize, n_x_buf)

    kernel = functools.partial(discriminator_kernel, mxu_dtype=mxu_dtype)

    out = pl.pallas_call(
        kernel,
        out_shape=jax.ShapeDtypeStruct((B, 1), jnp.float32),
        grid_spec=pltpu.PrefetchScalarGridSpec(
            num_scalar_prefetch=0,
            grid=(num_tiles,),
            in_specs=[
                x_spec,                                            # x tile (streamed)
                pl.BlockSpec((in_f, hidden), lambda i: (0, 0)),    # W1 (resident)
                pl.BlockSpec((1, hidden), lambda i: (0, 0)),       # b1 (resident)
                pl.BlockSpec((1, hidden), lambda i: (0, 0)),       # W2 row (resident)
                pl.BlockSpec(memory_space=pltpu.MemorySpace.SMEM),  # b2 scalar
            ],
            out_specs=pl.BlockSpec((tb, 1), lambda i: (i, 0)),
        ),
        compiler_params=pltpu.CompilerParams(
            dimension_semantics=("parallel",),  # batch tiles split across TCs
            vmem_limit_bytes=vmem_limit,
        ),
    )(x, w1, b1_in, w2_row, b2_s)

    return out


def init_discriminator_params(key, in_features, hidden=128):
    """Deterministic init matching nn.Linear's default U(-1/sqrt(fan_in), ...)."""
    k1, k2, k3, k4 = jax.random.split(key, 4)
    bound1 = 1.0 / jnp.sqrt(jnp.float32(in_features))
    bound2 = 1.0 / jnp.sqrt(jnp.float32(hidden))
    w1 = jax.random.uniform(k1, (in_features, hidden), jnp.float32, -bound1, bound1)
    b1 = jax.random.uniform(k2, (1, hidden), jnp.float32, -bound1, bound1)
    w2 = jax.random.uniform(k3, (hidden, 1), jnp.float32, -bound2, bound2)
    b2 = jax.random.uniform(k4, (1, 1), jnp.float32, -bound2, bound2)
    return w1, b1, w2, b2


def _reference(x, w1, b1, w2, b2):
    h = x.astype(jnp.float32) @ w1 + b1
    h = jnp.where(h >= 0, h, 0.01 * h)
    return jax.nn.sigmoid(h @ w2 + b2)


if __name__ == "__main__":
    key = jax.random.PRNGKey(0)
    k_x, k_p = jax.random.split(key)

    # MNIST-style flattened images: in_features = 28*28 = 784.
    batch, in_features = 8, 784
    x = jax.random.normal(k_x, (batch, in_features), dtype=jnp.float32)
    w1, b1, w2, b2 = init_discriminator_params(k_p, in_features)
    y_ref = _reference(x, w1, b1, w2, b2)

    # 1) f32 input, f32 MXU path: tight tolerance.
    out_f32 = jax.block_until_ready(discriminator_forward(x, w1, b1, w2, b2))
    assert out_f32.shape == (batch, 1)
    assert jnp.allclose(out_f32, y_ref, atol=1e-5, rtol=1e-5)

    # 2) Caller-provided bf16 x (half-bandwidth stream, no wrapper-side cast pass).
    out_bf16 = jax.block_until_ready(
        discriminator_forward(x.astype(jnp.bfloat16), w1, b1, w2, b2))
    assert out_bf16.shape == (batch, 1)
    assert jnp.allclose(out_bf16, y_ref, atol=3e-2, rtol=0)

    # 3) Ragged multi-tile batch: grid = cdiv(300, 128) = 3, partial last block
    #    (no jnp.pad / slicing), exercises the Buffered(3) x stream.
    batch2 = 300
    x2 = jax.random.normal(jax.random.PRNGKey(1), (batch2, in_features), jnp.float32)
    out2 = jax.block_until_ready(
        discriminator_forward(x2, w1, b1, w2, b2, batch_tile=128))
    assert out2.shape == (batch2, 1)
    assert jnp.allclose(out2, _reference(x2, w1, b1, w2, b2), atol=1e-5, rtol=1e-5)

    print("KERNEL_OK")
</pallas_src>

<mosaic_0001>
module attributes {stable_mosaic.version = 11 : i64} {
  func.func @discriminator_kernel(%arg0: i32, %arg1: memref<8x784xf32, #tpu.memory_space<vmem>>, %arg2: memref<784x128xf32, #tpu.memory_space<vmem>>, %arg3: memref<1x128xf32, #tpu.memory_space<vmem>>, %arg4: memref<1x128xf32, #tpu.memory_space<vmem>>, %arg5: memref<1xf32, #tpu.memory_space<smem>>, %arg6: memref<8x1xf32, #tpu.memory_space<vmem>>) attributes {dimension_semantics = [#tpu.dimension_semantics<parallel>], iteration_bounds = array<i64: 1>, scalar_prefetch = 0 : i64, scratch_operands = 0 : i64, tpu.core_type = #tpu.core_type<tc>, window_params = [{transform_indices = @transform_0, window_bounds = array<i64: 8, 784>}, {pipeline_mode = #tpu.pipeline_mode<synchronous>, transform_indices = @transform_1, window_bounds = array<i64: 784, 128>}, {pipeline_mode = #tpu.pipeline_mode<synchronous>, transform_indices = @transform_2, window_bounds = array<i64: 1, 128>}, {pipeline_mode = #tpu.pipeline_mode<synchronous>, transform_indices = @transform_3, window_bounds = array<i64: 1, 128>}, {transform_indices = @transform_4, window_bounds = array<i64: 1>}, {transform_indices = @transform_5, window_bounds = array<i64: 8, 1>}]} {
    %c0 = arith.constant 0 : index
    %c0_0 = arith.constant 0 : index
    %0 = vector.load %arg1[%c0, %c0_0] : memref<8x784xf32, #tpu.memory_space<vmem>>, vector<8x784xf32>
    %c0_1 = arith.constant 0 : index
    %c0_2 = arith.constant 0 : index
    %1 = vector.load %arg2[%c0_1, %c0_2] : memref<784x128xf32, #tpu.memory_space<vmem>>, vector<784x128xf32>
    %cst = arith.constant dense<0.000000e+00> : vector<8x128xf32>
    %2 = tpu.matmul %0, %1, %cst {dimension_numbers = #tpu.dot_dimension_numbers<[1], [0], [0], [1], [0, 0, 1, 1], [], []>} : vector<8x784xf32>, vector<784x128xf32>, vector<8x128xf32> -> vector<8x128xf32>
    %c0_3 = arith.constant 0 : index
    %c0_4 = arith.constant 0 : index
    %3 = vector.load %arg3[%c0_3, %c0_4] : memref<1x128xf32, #tpu.memory_space<vmem>>, vector<1x128xf32>
    %4 = vector.broadcast %3 : vector<1x128xf32> to vector<8x128xf32>
    %5 = arith.addf %2, %4 : vector<8x128xf32>
    %cst_5 = arith.constant 0.000000e+00 : f32
    %6 = vector.broadcast %cst_5 : f32 to vector<8x128xf32>
    %7 = arith.cmpf oge, %5, %6 : vector<8x128xf32>
    %cst_6 = arith.constant 0.00999999977 : f32
    %8 = vector.broadcast %cst_6 : f32 to vector<8x128xf32>
    %9 = arith.mulf %8, %5 : vector<8x128xf32>
    %10 = arith.select %7, %5, %9 : vector<8x128xi1>, vector<8x128xf32>
    %c0_7 = arith.constant 0 : index
    %c0_8 = arith.constant 0 : index
    %11 = vector.load %arg4[%c0_7, %c0_8] : memref<1x128xf32, #tpu.memory_space<vmem>>, vector<1x128xf32>
    %12 = vector.broadcast %11 : vector<1x128xf32> to vector<8x128xf32>
    %13 = arith.mulf %10, %12 : vector<8x128xf32>
    %cst_9 = arith.constant dense<0.000000e+00> : vector<8xf32>
    %14 = vector.multi_reduction <add>, %13, %cst_9 [1] : vector<8x128xf32> to vector<8xf32>
    %15 = vector.shape_cast %14 : vector<8xf32> to vector<8x1xf32>
    %c0_10 = arith.constant 0 : index
    %16 = memref.load %arg5[%c0_10] : memref<1xf32, #tpu.memory_space<smem>>
    %17 = vector.broadcast %16 : f32 to vector<8x1xf32>
    %18 = arith.addf %15, %17 : vector<8x1xf32>
    %19 = math.absf %18 : vector<8x1xf32>
    %cst_11 = arith.constant 0.000000e+00 : f32
    %20 = vector.broadcast %cst_11 : f32 to vector<8x1xf32>
    %21 = arith.subf %20, %19 : vector<8x1xf32>
    %22 = math.exp %21 : vector<8x1xf32>
    %cst_12 = arith.constant 0.000000e+00 : f32
    %23 = vector.broadcast %cst_12 : f32 to vector<8x1xf32>
    %24 = arith.cmpf oge, %18, %23 : vector<8x1xf32>
    %cst_13 = arith.constant 1.000000e+00 : f32
    %25 = vector.broadcast %cst_13 : f32 to vector<8x1xf32>
    %26 = arith.addf %25, %22 : vector<8x1xf32>
    %cst_14 = arith.constant 1.000000e+00 : f32
    %27 = vector.broadcast %cst_14 : f32 to vector<8x1xf32>
    %28 = arith.divf %27, %26 : vector<8x1xf32>
    %cst_15 = arith.constant 1.000000e+00 : f32
    %29 = vector.broadcast %cst_15 : f32 to vector<8x1xf32>
    %30 = arith.addf %29, %22 : vector<8x1xf32>
    %31 = arith.divf %22, %30 : vector<8x1xf32>
    %32 = arith.select %24, %28, %31 : vector<8x1xi1>, vector<8x1xf32>
    %c0_16 = arith.constant 0 : index
    %c0_17 = arith.constant 0 : index
    %33 = vector.load %arg6[%c0_16, %c0_17] : memref<8x1xf32, #tpu.memory_space<vmem>>, vector<8x1xf32>
    tpu.vector_store %arg6[%c0_16, %c0_17], %32 {strides = array<i32>} : memref<8x1xf32, #tpu.memory_space<vmem>>, vector<8x1xf32>,
    return
  }
  func.func @transform_0(%arg0: i32) -> (i32, i32) {
    %c0_i32 = arith.constant 0 : i32
    %c0_i32_0 = arith.constant 0 : i32
    return %arg0, %c0_i32 : i32, i32
  }
  func.func @transform_1(%arg0: i32) -> (i32, i32) {
    %c0_i32 = arith.constant 0 : i32
    %c0_i32_0 = arith.constant 0 : i32
    %c0_i32_1 = arith.constant 0 : i32
    return %c0_i32, %c0_i32_0 : i32, i32
  }
  func.func @transform_2(%arg0: i32) -> (i32, i32) {
    %c0_i32 = arith.constant 0 : i32
    %c0_i32_0 = arith.constant 0 : i32
    %c0_i32_1 = arith.constant 0 : i32
    return %c0_i32, %c0_i32_0 : i32, i32
  }
  func.func @transform_3(%arg0: i32) -> (i32, i32) {
    %c0_i32 = arith.constant 0 : i32
    %c0_i32_0 = arith.constant 0 : i32
    %c0_i32_1 = arith.constant 0 : i32
    return %c0_i32, %c0_i32_0 : i32, i32
  }
  func.func @transform_4(%arg0: i32) -> i32 {
    %c0_i32 = arith.constant 0 : i32
    %c0_i32_0 = arith.constant 0 : i32
    return %c0_i32 : i32
  }
  func.func @transform_5(%arg0: i32) -> (i32, i32) {
    %c0_i32 = arith.constant 0 : i32
    %c0_i32_0 = arith.constant 0 : i32
    return %arg0, %c0_i32 : i32, i32
  }
}

</mosaic_0001>

<bundles_post_ra>
// kernel: tpu_custom_call.1
= control target key start
LH: loop header
LB: loop body
LE: loop exit
PB: predicated region body
PF: predicated region fallthrough
CT: control target
= control target key end

     0   :  { %11 = vsyncpa [#allocation4], 0  ;;  %s463_s0 = inlined_call_operand.hbm [shape: f32[8,784], index: 0, kind: input, shape index: {}]   ;;  %s464_s1 = inlined_call_operand.hbm [shape: f32[784,128], index: 1, kind: input, shape index: {}]   ;;  %s465_s2 = inlined_call_operand.vmem [shape: f32[1,128], index: 2, kind: input, shape index: {}]   ;;  %s466_s3 = inlined_call_operand.vmem [shape: f32[1,128], index: 3, kind: input, shape index: {}]   ;;  %s467_s4 = inlined_call_operand.<no memory space> [shape: f32[1], index: 4, kind: input, shape index: {}]   ;;  %s468_s5 = inlined_call_operand.vmem [shape: f32[8,1], index: 5, kind: output, shape index: {}]  }
   0x1   :  { %s18_s20 = sshll.u32 %s463_s0, 4  ;;  %s19_s20 = int_to_ptr.hbm [resolvable:$true] %s18_s20 }
   0x2   :  { %12 = vsyncpa [#allocation6], 0  ;;  %s411_s21 = smov [#allocation3]   ;;  %s28_s25 = sshll.u32 %s464_s1, 4  ;;  %s29_s25 = int_to_ptr.hbm [resolvable:$true] %s28_s25 }
   0x3   :  { %s20_s22 = sshll.u32 %s411_s21, 4  ;;  %s412_s26 = smov [#allocation5]   ;;  %s21_s22 = int_to_ptr.vmem [resolvable:$true] %s20_s22 }
   0x4   :  { %23 = dma.hbm_to_vmem [thread:$0]  %s19_s20, 896, %s21_s22, [#allocation4]  }
   0x5   :  { %s30_s27 = sshll.u32 %s412_s26, 4  ;;  %s413_s28 = smov 128   ;;  %s31_s27 = int_to_ptr.vmem [resolvable:$true] %s30_s27 }
   0x6   :  { %s414_s29 = smov 8  }
   0x7   :  { %36 = dma.hbm_to_vmem [thread:$0]  %s29_s25, 12544, %s31_s27, [#allocation6], %s413_s28, %s413_s28, %s414_s29  }
   0x8   :  { %407 = dma.done.wait [#allocation4], 896  }
   0x9   :  { %408 = vsyncadd [#allocation4], 4294966400 }
   0xa   :  { %409 = dma.done.wait [#allocation6], 12544  }
   0xb   :  { %410 = vsyncadd [#allocation6], 4294954752  ;;  %v73_v0 = vld [vmem:[#allocation5 + $0x78] sm:$0xff]  ;;  %v72_v1 = vld [vmem:[#allocation5 + $0x70] sm:$0xff]  ;;  %vm160_vm0 = vcmask 130048   ;;  %vm340_vm6 = vcmask 7168  }
   0xc   :  { %v89_v2 = vld [vmem:[#allocation5 + $0xf8] sm:$0xff]  ;;  %164 = vmatpush.msra.mxu0 %v73_v0  ;;  %v88_v3 = vld [vmem:[#allocation5 + $0xf0] sm:$0xff]  ;;  %v71_v4 = vld [vmem:[#allocation5 + $0x68] sm:$0xff] }
   0xd   :  { %184 = vmatpush.msra.mxu1 %v89_v2  ;;  %v87_v5 = vld [vmem:[#allocation5 + $0xe8] sm:$0xff]  ;;  %v70_v6 = vld [vmem:[#allocation5 + $0x60] sm:$0xff]  ;;  %v69_v8 = vld [vmem:[#allocation5 + $0x58] sm:$0xff] }
   0xe   :  { %165 = vmatpush.msra.mxu0 %v72_v1  ;;  %v86_v7 = vld [vmem:[#allocation5 + $0xe0] sm:$0xff]  ;;  %v85_v9 = vld [vmem:[#allocation5 + $0xd8] sm:$0xff]  ;;  %v68_v10 = vld [vmem:[#allocation5 + $0x50] sm:$0xff] }
   0xf   :  { %185 = vmatpush.msra.mxu1 %v88_v3  ;;  %v105_v11 = vld [vmem:[#allocation5 + $0x178] sm:$0xff]  ;;  %v84_v12 = vld [vmem:[#allocation5 + $0xd0] sm:$0xff]  ;;  %v103_v15 = vld [vmem:[#allocation5 + $0x168] sm:$0xff] }
  0x10   :  { %166 = vmatpush.msra.mxu0 %v71_v4  ;;  %204 = vmatpush.msra.mxu2 %v105_v11  ;;  %v104_v13 = vld [vmem:[#allocation5 + $0x170] sm:$0xff]  ;;  %v121_v14 = vld [vmem:[#allocation5 + $0x1f8] sm:$0xff]  ;;  %v67_v17 = vld [vmem:[#allocation5 + $0x48] sm:$0xff] }
  0x11   :  { %186 = vmatpush.msra.mxu1 %v87_v5  ;;  %v120_v16 = vld [vmem:[#allocation5 + $0x1f0] sm:$0xff]  ;;  %v83_v18 = vld [vmem:[#allocation5 + $0xc8] sm:$0xff]  ;;  %224 = vmatpush.msra.mxu3 %v121_v14  ;;  %v102_v19 = vld [vmem:[#allocation5 + $0x160] sm:$0xff] }
  0x12   :  { %167 = vmatpush.msra.mxu0 %v70_v6  ;;  %205 = vmatpush.msra.mxu2 %v104_v13  ;;  %v119_v20 = vld [vmem:[#allocation5 + $0x1e8] sm:$0xff]  ;;  %v66_v21 = vld [vmem:[#allocation5 + $0x40] sm:$0xff]  ;;  %v101_v23 = vld [vmem:[#allocation5 + $0x158] sm:$0xff] }
  0x13   :  { %187 = vmatpush.msra.mxu1 %v86_v7  ;;  %v82_v22 = vld [vmem:[#allocation5 + $0xc0] sm:$0xff]  ;;  %225 = vmatpush.msra.mxu3 %v120_v16  ;;  %v65_v25 = vld [vmem:[#allocation5 + $0x38] sm:$0xff]  ;;  %v100_v27 = vld [vmem:[#allocation5 + $0x150] sm:$0xff] }
  0x14   :  { %168 = vmatpush.msra.mxu0 %v69_v8  ;;  %206 = vmatpush.msra.mxu2 %v103_v15  ;;  %v118_v24 = vld [vmem:[#allocation5 + $0x1e0] sm:$0xff]  ;;  %v81_v26 = vld [vmem:[#allocation5 + $0xb8] sm:$0xff]  ;;  %v64_v29 = vld [vmem:[#allocation5 + $0x30] sm:$0xff] }
  0x15   :  { %188 = vmatpush.msra.mxu1 %v85_v9  ;;  %226 = vmatpush.msra.mxu3 %v119_v20  ;;  %v117_v28 = vld [vmem:[#allocation5 + $0x1d8] sm:$0xff]  ;;  %v80_v30 = vld [vmem:[#allocation5 + $0xb0] sm:$0xff]  ;;  %v99_v31 = vld [vmem:[#allocation5 + $0x148] sm:$0xff] }
  0x16   :  { %169 = vmatpush.msra.mxu0 %v68_v10  ;;  %207 = vmatpush.msra.mxu2 %v102_v19  ;;  %v116_v32 = vld [vmem:[#allocation5 + $0x1d0] sm:$0xff]  ;;  %v63_v33 = vld [vmem:[#allocation5 + $0x28] sm:$0xff]  ;;  %v98_v35 = vld [vmem:[#allocation5 + $0x140] sm:$0xff] }
  0x17   :  { %189 = vmatpush.msra.mxu1 %v84_v12  ;;  %227 = vmatpush.msra.mxu3 %v118_v24  ;;  %v79_v34 = vld [vmem:[#allocation5 + $0xa8] sm:$0xff]  ;;  %v62_v37 = vld [vmem:[#allocation5 + $0x20] sm:$0xff]  ;;  %v97_v39 = vld [vmem:[#allocation5 + $0x138] sm:$0xff] }
  0x18   :  { %170 = vmatpush.msra.mxu0 %v67_v17  ;;  %208 = vmatpush.msra.mxu2 %v101_v23  ;;  %v115_v36 = vld [vmem:[#allocation5 + $0x1c8] sm:$0xff]  ;;  %v78_v38 = vld [vmem:[#allocation5 + $0xa0] sm:$0xff]  ;;  %v61_v41 = vld [vmem:[#allocation5 + $0x18] sm:$0xff] }
  0x19   :  { %190 = vmatpush.msra.mxu1 %v83_v18  ;;  %228 = vmatpush.msra.mxu3 %v117_v28  ;;  %v114_v40 = vld [vmem:[#allocation5 + $0x1c0] sm:$0xff]  ;;  %v77_v42 = vld [vmem:[#allocation5 + $0x98] sm:$0xff]  ;;  %v96_v43 = vld [vmem:[#allocation5 + $0x130] sm:$0xff] }
  0x1a   :  { %171 = vmatpush.msra.mxu0 %v66_v21  ;;  %209 = vmatpush.msra.mxu2 %v100_v27  ;;  %v113_v44 = vld [vmem:[#allocation5 + $0x1b8] sm:$0xff]  ;;  %v60_v45 = vld [vmem:[#allocation5 + $0x10] sm:$0xff]  ;;  %v95_v47 = vld [vmem:[#allocation5 + $0x128] sm:$0xff] }
  0x1b   :  { %191 = vmatpush.msra.mxu1 %v82_v22  ;;  %229 = vmatpush.msra.mxu3 %v116_v32  ;;  %v76_v46 = vld [vmem:[#allocation5 + $0x90] sm:$0xff]  ;;  %v59_v49 = vld [vmem:[#allocation5 + $0x8] sm:$0xff]  ;;  %v94_v51 = vld [vmem:[#allocation5 + $0x120] sm:$0xff] }
  0x1c   :  { %172 = vmatpush.msra.mxu0 %v65_v25  ;;  %210 = vmatpush.msra.mxu2 %v99_v31  ;;  %v112_v48 = vld [vmem:[#allocation5 + $0x1b0] sm:$0xff]  ;;  %v75_v50 = vld [vmem:[#allocation5 + $0x88] sm:$0xff]  ;;  %v58_v53 = vld [vmem:[#allocation5] sm:$0xff] }
  0x1d   :  { %192 = vmatpush.msra.mxu1 %v81_v26  ;;  %230 = vmatpush.msra.mxu3 %v115_v36  ;;  %v111_v52 = vld [vmem:[#allocation5 + $0x1a8] sm:$0xff]  ;;  %v74_v54 = vld [vmem:[#allocation5 + $0x80] sm:$0xff]  ;;  %v137_v55 = vld [vmem:[#allocation5 + $0x278] sm:$0xff] }
  0x1e   :  { %173 = vmatpush.msra.mxu0 %v64_v29  ;;  %211 = vmatpush.msra.mxu2 %v98_v35  ;;  %v153_v56 = vld [vmem:[#allocation5 + $0x2f8] sm:$0xff]  ;;  %v110_v58 = vld [vmem:[#allocation5 + $0x1a0] sm:$0xff]  ;;  %v136_v59 = vld [vmem:[#allocation5 + $0x270] sm:$0xff] }
  0x1f   :  { %193 = vmatpush.msra.mxu1 %v80_v30  ;;  %231 = vmatpush.msra.mxu3 %v114_v40  ;;  %v93_v57 = vld [vmem:[#allocation5 + $0x118] sm:$0xff]  ;;  %v152_v60 = vld [vmem:[#allocation5 + $0x2f0] sm:$0xff]  ;;  %v135_v63 = vld [vmem:[#allocation5 + $0x268] sm:$0xff] }
  0x20   :  { %174 = vmatpush.msra.mxu0 %v63_v33  ;;  %212 = vmatpush.msra.mxu2 %v97_v39  ;;  %v92_v61 = vld [vmem:[#allocation5 + $0x110] sm:$0xff]  ;;  %v109_v62 = vld [vmem:[#allocation5 + $0x198] sm:$0xff]  ;;  %v151_v0 = vld [vmem:[#allocation5 + $0x2e8] sm:$0xff] }
  0x21   :  { %194 = vmatpush.msra.mxu1 %v79_v34  ;;  %232 = vmatpush.msra.mxu3 %v113_v44  ;;  %v134_v1 = vld [vmem:[#allocation5 + $0x260] sm:$0xff]  ;;  %v91_v2 = vld [vmem:[#allocation5 + $0x108] sm:$0xff]  ;;  %v108_v3 = vld [vmem:[#allocation5 + $0x190] sm:$0xff] }
  0x22   :  { %175 = vmatpush.msra.mxu0 %v62_v37  ;;  %213 = vmatpush.msra.mxu2 %v96_v43  ;;  %v150_v4 = vld [vmem:[#allocation5 + $0x2e0] sm:$0xff]  ;;  %v107_v6 = vld [vmem:[#allocation5 + $0x188] sm:$0xff]  ;;  %v133_v7 = vld [vmem:[#allocation5 + $0x258] sm:$0xff] }
  0x23   :  { %195 = vmatpush.msra.mxu1 %v78_v38  ;;  %233 = vmatpush.msra.mxu3 %v112_v48  ;;  %v90_v5 = vld [vmem:[#allocation5 + $0x100] sm:$0xff]  ;;  %v149_v8 = vld [vmem:[#allocation5 + $0x2d8] sm:$0xff]  ;;  %v132_v11 = vld [vmem:[#allocation5 + $0x250] sm:$0xff] }
  0x24   :  { %176 = vmatpush.msra.mxu0 %v61_v41  ;;  %214 = vmatpush.msra.mxu2 %v95_v47  ;;  %v53_v9 = vld [vmem:[#allocation3 + $0x10] sm:$0xff]  ;;  %v106_v10 = vld [vmem:[#allocation5 + $0x180] sm:$0xff]  ;;  %v148_v12 = vld [vmem:[#allocation5 + $0x2d0] sm:$0xff] }
  0x25   :  { %196 = vmatpush.msra.mxu1 %v77_v42  ;;  %234 = vmatpush.msra.mxu3 %v111_v52  ;;  %v155_v13 = vld [vmem:[#allocation5 + $0x308] sm:$0xff]  ;;  %v54_v17 = vld [vmem:[#allocation3 + $0x18] sm:$0xff]  ;;  %v52_v18 = vld [vmem:[#allocation3 + $0x8] sm:$0xff] }
  0x26   :  { %177 = vmatpush.msra.mxu0 %v60_v45  ;;  %215 = vmatpush.msra.mxu2 %v94_v51  ;;  %v51_v14 = vld [vmem:[#allocation3] sm:$0xff]  ;;  %v130_v19 = vld [vmem:[#allocation5 + $0x240] sm:$0xff]  ;;  %v129_v22 = vld [vmem:[#allocation5 + $0x238] sm:$0xff] }
  0x27   :  { %197 = vmatpush.msra.mxu1 %v76_v46  ;;  %235 = vmatpush.msra.mxu3 %v110_v58  ;;  %v131_v15 = vld [vmem:[#allocation5 + $0x248] sm:$0xff]  ;;  %v146_v20 = vld [vmem:[#allocation5 + $0x2c0] sm:$0xff]  ;;  %v145_v23 = vld [vmem:[#allocation5 + $0x2b8] sm:$0xff] }
  0x28   :  { %178 = vmatpush.msra.mxu0 %v59_v49  ;;  %216 = vmatpush.msra.mxu2 %v93_v57  ;;  %v147_v16 = vld [vmem:[#allocation5 + $0x2c8] sm:$0xff]  ;;  %v154_v21 = vld [vmem:[#allocation5 + $0x300] sm:$0xff]  ;;  %v57_v24 = vld [vmem:[#allocation3 + $0x30] sm:$0xff] }
  0x29   :  { %198 = vmatpush.msra.mxu1 %v75_v50  ;;  %236 = vmatpush.msra.mxu3 %v109_v62  ;;  %v128_v25 = vld [vmem:[#allocation5 + $0x230] sm:$0xff]  ;;  %v127_v27 = vld [vmem:[#allocation5 + $0x228] sm:$0xff]  ;;  %v126_v29 = vld [vmem:[#allocation5 + $0x220] sm:$0xff] }
  0x2a   :  { %179 = vmatpush.msra.mxu0 %v58_v53  ;;  %217 = vmatpush.msra.mxu2 %v92_v61  ;;  %v144_v26 = vld [vmem:[#allocation5 + $0x2b0] sm:$0xff]  ;;  %v143_v28 = vld [vmem:[#allocation5 + $0x2a8] sm:$0xff]  ;;  %v142_v30 = vld [vmem:[#allocation5 + $0x2a0] sm:$0xff] }
  0x2b   :  { %199 = vmatpush.msra.mxu1 %v74_v54  ;;  %237 = vmatpush.msra.mxu3 %v108_v3  ;;  %v125_v31 = vld [vmem:[#allocation5 + $0x218] sm:$0xff]  ;;  %v124_v33 = vld [vmem:[#allocation5 + $0x210] sm:$0xff]  ;;  %v123_v35 = vld [vmem:[#allocation5 + $0x208] sm:$0xff] }
  0x2c   :  { %244 = vmatpush.msrb.mxu0 %v137_v55  ;;  %218 = vmatpush.msra.mxu2 %v91_v2  ;;  %v141_v32 = vld [vmem:[#allocation5 + $0x298] sm:$0xff]  ;;  %v140_v34 = vld [vmem:[#allocation5 + $0x290] sm:$0xff]  ;;  %v139_v36 = vld [vmem:[#allocation5 + $0x288] sm:$0xff] }
  0x2d   :  { %264 = vmatpush.msrb.mxu1 %v153_v56  ;;  %238 = vmatpush.msra.mxu3 %v107_v6  ;;  %v122_v37 = vld [vmem:[#allocation5 + $0x200] sm:$0xff]  ;;  %v55_v39 = vld [vmem:[#allocation3 + $0x20] sm:$0xff]  ;;  %v56_v40 = vld [vmem:[#allocation3 + $0x28] sm:$0xff] }
  0x2e   :  { %245 = vmatpush.msrb.mxu0 %v136_v59  ;;  %219 = vmatpush.msra.mxu2 %v90_v5  ;;  %v138_v38 = vld [vmem:[#allocation5 + $0x280] sm:$0xff]  ;;  %v353_v41 = vld [vmem:[%s465_s2] ss:$0 sm:$0xff] }
  0x2f   :  { %265 = vmatpush.msrb.mxu1 %v152_v60  ;;  %220 = vmatmul.f32.vlgmr.msra.gmra.mxu2 %v53_v9  ;;  %v354_v56 = vld [vmem:[%s466_s3] ss:$0 sm:$0xff]  ;;  %v315_v60 = vstv %s467_s4 }
  0x30   :  { %246 = vmatpush.msrb.mxu0 %v135_v63  ;;  %239 = vmatpush.msra.mxu3 %v106_v10 }
  0x31   :  { %266 = vmatpush.msrb.mxu1 %v151_v0  ;;  %298 = vmatpush.msrb.mxu2 %v155_v13 }
  0x32   :  { %247 = vmatpush.msrb.mxu0 %v134_v1  ;;  %240 = vmatmul.f32.vlgmr.msra.gmra.mxu3 %v54_v17 }
  0x33   :  { %267 = vmatpush.msrb.mxu1 %v150_v4  ;;  %180 = vmatmul.f32.vlgmr.msra.gmra.mxu0 %v51_v14 }
  0x34   :  { %248 = vmatpush.msrb.mxu0 %v133_v7  ;;  %200 = vmatmul.f32.vlgmr.msra.gmra.mxu1 %v52_v18 }
  0x35   :  { %268 = vmatpush.msrb.mxu1 %v149_v8  ;;  %299 = vmatpush.msrb.mxu2 %v154_v21 }
  0x36   :  { %249 = vmatpush.msrb.mxu0 %v132_v11 }
  0x37   :  { %269 = vmatpush.msrb.mxu1 %v148_v12  ;;  %348 = vmatmul.msk.f32.vlgmr.msrb.gmra.mxu2 %vm160_vm0, %v57_v24 }
  0x38   :  { %250 = vmatpush.msrb.mxu0 %v131_v15 }
  0x39   :  { %270 = vmatpush.msrb.mxu1 %v147_v16 }
  0x3a   :  { %251 = vmatpush.msrb.mxu0 %v130_v19 }
  0x3b   :  { %271 = vmatpush.msrb.mxu1 %v146_v20 }
  0x3c   :  { %252 = vmatpush.msrb.mxu0 %v129_v22 }
  0x3d   :  { %272 = vmatpush.msrb.mxu1 %v145_v23 }
  0x3e   :  { %253 = vmatpush.msrb.mxu0 %v128_v25 }
  0x3f   :  { %273 = vmatpush.msrb.mxu1 %v144_v26 }
  0x40   :  { %254 = vmatpush.msrb.mxu0 %v127_v27 }
  0x41   :  { %274 = vmatpush.msrb.mxu1 %v143_v28 }
  0x42   :  { %255 = vmatpush.msrb.mxu0 %v126_v29 }
  0x43   :  { %275 = vmatpush.msrb.mxu1 %v142_v30 }
  0x44   :  { %256 = vmatpush.msrb.mxu0 %v125_v31 }
  0x45   :  { %276 = vmatpush.msrb.mxu1 %v141_v32 }
  0x46   :  { %257 = vmatpush.msrb.mxu0 %v124_v33 }
  0x47   :  { %277 = vmatpush.msrb.mxu1 %v140_v34 }
  0x48   :  { %258 = vmatpush.msrb.mxu0 %v123_v35 }
  0x49   :  { %278 = vmatpush.msrb.mxu1 %v139_v36 }
  0x4a   :  { %259 = vmatpush.msrb.mxu0 %v122_v37 }
  0x4b   :  { %279 = vmatpush.msrb.mxu1 %v138_v38  ;;  %260 = vmatmul.f32.vlgmr.msrb.gmra.mxu0 %v55_v39 }
  0x4c   :  { %280 = vmatmul.f32.vlgmr.msrb.gmra.mxu1 %v56_v40 }
  0xb0   :  { %v181_v42 = vpop.f32.mrf.mxu0 }
  0xb1   :  { %v182_v43 = vadd.f32 %v353_v41, %v181_v42  ;;  %v201_v44 = vpop.f32.mrf.mxu1 }
  0xb2   :  { %v221_v46 = vpop.f32.mrf.mxu2 }
  0xb3   :  { %v202_v45 = vadd.f32 %v201_v44, %v182_v43 }
  0xb5   :  { %v222_v47 = vadd.f32 %v221_v46, %v202_v45  ;;  %v241_v48 = vpop.f32.mrf.mxu3 }
  0xb7   :  { %v242_v49 = vadd.f32 %v241_v48, %v222_v47 }
  0xba   :  { %v301_v53 = vpop.f32.mrf.mxu2 }
  0xc8   :  { %v261_v50 = vpop.f32.mrf.mxu0 }
  0xc9   :  { %v281_v51 = vpop.f32.mrf.mxu1  ;;  %v262_v52 = vadd.f32 %v261_v50, %v242_v49 }
  0xcb   :  { %v282_v54 = vadd.f32 %v281_v51, %v262_v52 }
  0xcd   :  { %v302_v55 = vadd.f32 %v301_v53, %v282_v54 }
  0xcf   :  { %v305_v57 = vmul.f32 0.01, %v302_v55  ;;  %vm304_vm1 = vcmp.ge.f32.partialorder %v302_v55, 0.0 }
  0xd1   :  { %v306_v58 = vsel %vm304_vm1, %v302_v55, %v305_v57 }
  0xd2   :  { %v311_v59 = vmul.f32 %v354_v56, %v306_v58 }
  0xd4   :  { %312 = vadd.xlane.f32.xlu0 %v311_v59 }
 0x147   :  { %v313_v61 = vpop.xlane.xlu0 %312 }
 0x148   :  { %v316_v62 = vadd.f32 %v315_v60, %v313_v61 }
 0x14a   :  { %v317_v63 = vand.u32 2147483647, %v316_v62  ;;  %vm321_vm7 = vcmp.ge.f32.partialorder %v316_v62, 0.0 }
 0x14c   :  { %v318_v0 = vsub.f32 0.0, %v317_v63 }
 0x14e   :  { %v319_v1 = vmul.f32 1.442695, %v318_v0 }
 0x150   :  { %355 = vpow2.f32 %v319_v1 }
 0x156   :  { %v356_v2 = vpop.eup %355 }
 0x157   :  { %v322_v3 = vadd.f32 1.0, %v356_v2 }
 0x159   :  { %357 = vrcp.f32 %v322_v3  ;;  %v334_v7 = vand.u32 2147483648, %v322_v3  ;;  %v332_v9 = vand.u32 2147483647, %v322_v3  ;;  %vm328_vm3 = vweird.f32 %v322_v3 }
 0x15b   :  { %v335_v11 = vor.u32 1.1754944e-38, %v334_v7  ;;  %vm333_vm5 = vcmp.eq.f32.partialorder %v332_v9, 8.507059e+37 }
 0x15f   :  { %v358_v4 = vpop.eup %357 }
 0x160   :  { %v324_v5 = vmul.f32 %v358_v4, %v322_v3  ;;  %vm329_vm2 = vweird.f32 %v358_v4 }
 0x161   :  { %vm330_vm4 = vmor %vm328_vm3, %vm329_vm2 }
 0x162   :  { %v325_v6 = vsub.f32 1.0, %v324_v5 }
 0x164   :  { %v326_v8 = vmul.f32 %v358_v4, %v325_v6 }
 0x166   :  { %v327_v10 = vadd.f32 %v358_v4, %v326_v8 }
 0x168   :  { %v331_v12 = vsel %vm330_vm4, %v358_v4, %v327_v10 }
 0x169   :  { %v336_v13 = vsel %vm333_vm5, %v335_v11, %v331_v12 }
 0x16a   :  { %v338_v14 = vmul.f32 %v356_v2, %v336_v13 }
 0x16c   :  { %v339_v15 = vsel %vm321_vm7, %v336_v13, %v338_v14 }
 0x16d   :  { %341 = vst.msk [vmem:[%s468_s5] sm:$0xff] %vm340_vm6, %v339_v15 }
 0x16e   :  { %346 = vsyncpa [#allocation4], 1 }
 0x16f   :  { %347 = vsyncpa [#allocation6], 1 }

</bundles_post_ra>
